<compile_context>
chip_gen: v7x
topology: tpu7x:2x2x1
jax: 0.10.0
libtpu: 0.0.40
codegen_flags: <defaults>
</compile_context>

<pallas_src>
import functools

import jax
import jax.numpy as jnp
from jax.experimental import pallas as pl
from jax.experimental.pallas import tpu as pltpu


def _round_up(x, m):
    return ((x + m - 1) // m) * m


# -----------------------------------------------------------------------------
# CORAL kernel
#   x_ref   : (TN, D)   feature rows, source dtype (f32 or bf16), natural layout
#   w_ref   : (1, D)    Linear(D -> 1) weight, same dtype as x
#   thr_ref : (K-1, 1)  ordered thresholds with the linear bias folded in (f32)
#   out_ref : (K, TN)   class probabilities (f32), lane-dense
# -----------------------------------------------------------------------------
def _coral_kernel(x_ref, w_ref, thr_ref, out_ref, *, num_classes):
    K = num_classes
    Km1 = K - 1

    x = x_ref[...]        # no upcast: MXU takes bf16/f32 natively, accumulates f32
    w = w_ref[...]        # (1, D)
    thr = thr_ref[...]    # (Km1, 1) == tau_k - b

    # f(x) contracted over D -> lane-dense (1, TN).  Contracting the last dims
    # of both operands (q@k^T-style) avoids any wrapper-side transpose of x.
    scores = jax.lax.dot_general(
        w, x, (((1,), (1,)), ((), ())),
        preferred_element_type=jnp.float32)                  # (1, TN)

    # Cumulative probabilities P(Y > k | x) = sigmoid(f(x) + b - tau_k).
    cum = jax.nn.sigmoid(scores - thr)                        # (Km1, TN)

    # Class probabilities along the sublane axis -> (K, TN)
    #   P(Y=0)   = 1 - cum[0]
    #   P(Y=k)   = cum[k-1] - cum[k]   for 1 <= k <= K-2
    #   P(Y=K-1) = cum[K-2]
    parts = [1.0 - cum[0:1, :]]
    if K > 2:
        parts.append(cum[: Km1 - 1, :] - cum[1:Km1, :])
    parts.append(cum[Km1 - 1:Km1, :])
    probs = jnp.concatenate(parts, axis=0)                    # (K, TN)

    # softmax(log(clamp(p, 1e-8))) == clamp + exact renormalization.
    p = jnp.maximum(probs, 1e-8)
    inv = 1.0 / jnp.sum(p, axis=0, keepdims=True)             # exact divide
    out_ref[...] = (p * inv).astype(out_ref.dtype)


def _pick_row_tile(n, d, k, in_bytes, budget_bytes):
    """Column-block width from a VMEM budget for the double-buffered blocks.

    VMEM layout pads the minor dim of the (rt, D) input block to 128 lanes and
    the K rows of the f32 output block to 8 sublanes, so budget padded bytes.
    """
    d_pad = _round_up(d, 128)
    k_pad = _round_up(k, 8)
    per_row = 2 * d_pad * in_bytes + 2 * k_pad * 4
    rt = max(128, (budget_bytes // per_row) // 128 * 128)
    n_up = _round_up(n, 128)
    # Keep at least two grid blocks when possible so both v7x TensorCores work.
    if rt * 2 > n_up and n_up >= 256:
        rt = _round_up(n_up // 2, 128)
    return min(rt, n_up)


def coral_forward(features, coral_w, coral_b, raw_thresholds, num_classes,
                  row_tile=None, vmem_block_budget_bytes=16 * 1024 * 1024):
    """Pallas-backed CoralLayer.forward over features of shape (..., input_dim)."""
    orig_shape = features.shape
    D = orig_shape[-1]
    K = int(num_classes)
    if K <= 1:
        return jnp.ones((*orig_shape[:-1], 1), jnp.float32)
    Km1 = K - 1

    # Natural (N, D) row layout: no wrapper-side transpose, no jnp.pad copy.
    x2d = features.reshape(-1, D)
    N = x2d.shape[0]
    in_bytes = x2d.dtype.itemsize

    # Hoisted constants: ordered thresholds = cumsum(softplus(raw)), bias folded:
    #   sigmoid(x@w + b - tau) == sigmoid(x@w - (tau - b))
    thr = jnp.cumsum(jax.nn.softplus(raw_thresholds.astype(jnp.float32)))
    thr_adj = (thr - coral_b.reshape(()).astype(jnp.float32)).reshape(Km1, 1)
    # Feed the MXU in the feature dtype (bf16-native) - no per-tile upcast pass.
    w2d = coral_w.reshape(1, D).astype(x2d.dtype)

    if row_tile is None:
        rt = _pick_row_tile(N, D, K, in_bytes, vmem_block_budget_bytes)
    else:
        rt = min(_round_up(max(int(row_tile), 128), 128), _round_up(N, 128))

    grid = (pl.cdiv(N, rt),)  # padded last block; OOB writes dropped by Pallas

    # VMEM limit from the actual (layout-padded) double-buffered footprint.
    footprint = (2 * rt * _round_up(D, 128) * in_bytes
                 + 2 * _round_up(K, 8) * rt * 4)
    vmem_limit = int(min(64 * 1024 * 1024,
                         max(8 * 1024 * 1024, footprint + 4 * 1024 * 1024)))

    out_t = pl.pallas_call(
        functools.partial(_coral_kernel, num_classes=K),
        out_shape=jax.ShapeDtypeStruct((K, N), jnp.float32),
        grid=grid,
        in_specs=[
            pl.BlockSpec((rt, D), lambda i: (i, 0)),      # feature rows (natural layout)
            pl.BlockSpec((1, D), lambda i: (0, 0)),       # linear weight row
            pl.BlockSpec((Km1, 1), lambda i: (0, 0)),     # bias-folded thresholds
        ],
        out_specs=pl.BlockSpec((K, rt), lambda i: (0, i)),  # lane-dense class probs
        compiler_params=pltpu.CompilerParams(
            dimension_semantics=("parallel",),
            vmem_limit_bytes=vmem_limit,
        ),
    )(x2d, w2d, thr_adj)

    # (K, N) -> (..., K).  K is tiny, so this final transpose is a small
    # fraction of the feature-read traffic (unlike a (N, D) pre-transpose).
    return out_t.T.reshape(*orig_shape[:-1], K)


# -----------------------------------------------------------------------------
# Synthetic DKVMN base model (glue, plain JAX)
# TODO(synk): the real base DKVMN memory network is not defined in the module;
# a deterministic synthetic feature extractor with matching output shapes is used.
# -----------------------------------------------------------------------------
def base_get_features(params, q_data, r_data):
    q_emb = params["q_embed"][q_data]                                    # (B, T, D)
    r_emb = params["r_embed"][r_data]                                    # (B, T, D)
    h = jnp.tanh(q_emb + r_emb)
    summary = jnp.tanh(h @ params["W_sum"] + params["b_sum"])            # (B, T, D)
    student_abilities = (summary @ params["W_theta"])[..., 0]            # (B, T)
    item_thresholds = summary @ params["W_beta"]                         # (B, T, K-1)
    discrimination = jax.nn.softplus((summary @ params["W_alpha"])[..., 0])  # (B, T)
    return student_abilities, item_thresholds, discrimination, summary


def dkvmn_coral_forward(params, coral_params, q_data, r_data, num_classes):
    abilities, item_thr, disc, summary = base_get_features(params, q_data, r_data)
    coral_probs = coral_forward(
        summary, coral_params["w"], coral_params["b"], coral_params["raw_thr"],
        num_classes)
    return abilities, item_thr, disc, coral_probs


# Pure-JAX reference for the CORAL layer (matches the PyTorch module exactly).
def coral_reference(summary, w, b, raw_thr, K):
    scores = summary @ w + b[0]
    thr = jnp.cumsum(jax.nn.softplus(raw_thr))
    cum = jax.nn.sigmoid(scores[..., None] - thr)
    parts = [1.0 - cum[..., 0:1]]
    if K > 2:
        parts.append(cum[..., :-1] - cum[..., 1:])
    parts.append(cum[..., -1:])
    probs = jnp.concatenate(parts, axis=-1)
    return jax.nn.softmax(jnp.log(jnp.maximum(probs, 1e-8)), axis=-1)


if __name__ == "__main__":
    B, T, D, K, NQ = 2, 8, 32, 4, 10   # batch, seq, coral_input_dim, n_cats, n_questions

    key = jax.random.PRNGKey(0)
    keys = jax.random.split(key, 12)

    q_data = jax.random.randint(keys[0], (B, T), 0, NQ)
    r_data = jax.random.randint(keys[1], (B, T), 0, K)

    params = {
        "q_embed": 0.1 * jax.random.normal(keys[2], (NQ, D), jnp.float32),
        "r_embed": 0.1 * jax.random.normal(keys[3], (K, D), jnp.float32),
        "W_sum":   0.1 * jax.random.normal(keys[4], (D, D), jnp.float32),
        "b_sum":   jnp.zeros((D,), jnp.float32),
        "W_theta": 0.1 * jax.random.normal(keys[5], (D, 1), jnp.float32),
        "W_beta":  0.1 * jax.random.normal(keys[6], (D, K - 1), jnp.float32),
        "W_alpha": 0.1 * jax.random.normal(keys[7], (D, 1), jnp.float32),
    }

    # CoralLayer params: Linear(D, 1, bias=True) + raw_thresholds init to zeros
    coral_params = {
        "w": (1.0 / jnp.sqrt(D)) * jax.random.normal(keys[8], (D,), jnp.float32),
        "b": 0.01 * jax.random.normal(keys[9], (1,), jnp.float32),
        "raw_thr": jnp.zeros((K - 1,), jnp.float32),
    }

    abilities, item_thr, disc, coral_probs = jax.block_until_ready(
        dkvmn_coral_forward(params, coral_params, q_data, r_data, K))

    # Correctness vs pure-JAX reference.  Value tolerance covers MXU matmul
    # precision; row sums are exact now (no approximate reciprocal).
    _, _, _, summary = base_get_features(params, q_data, r_data)
    ref = coral_reference(summary, coral_params["w"], coral_params["b"],
                          coral_params["raw_thr"], K)
    assert coral_probs.shape == (B, T, K)
    assert abilities.shape == (B, T)
    assert item_thr.shape == (B, T, K - 1)
    assert disc.shape == (B, T)
    assert jnp.allclose(coral_probs, ref, atol=5e-3, rtol=5e-3)
    assert jnp.allclose(jnp.sum(coral_probs, axis=-1), 1.0, atol=1e-5)

    # Multi-block grid + partial (non-divisible) last block, no wrapper pad.
    feats2 = 0.5 * jax.random.normal(keys[10], (3, 50, D), jnp.float32)
    out2 = jax.block_until_ready(coral_forward(
        feats2, coral_params["w"], coral_params["b"], coral_params["raw_thr"], K))
    ref2 = coral_reference(feats2, coral_params["w"], coral_params["b"],
                           coral_params["raw_thr"], K)
    assert out2.shape == (3, 50, K)
    assert jnp.allclose(out2, ref2, atol=5e-3, rtol=5e-3)
    assert jnp.allclose(jnp.sum(out2, axis=-1), 1.0, atol=1e-5)

    # bf16 transport straight to the MXU (no in-kernel upcast).
    feats3 = (0.5 * jax.random.normal(keys[11], (3, 37, D), jnp.float32)
              ).astype(jnp.bfloat16)
    out3 = jax.block_until_ready(coral_forward(
        feats3, coral_params["w"], coral_params["b"], coral_params["raw_thr"], K))
    ref3 = coral_reference(feats3.astype(jnp.float32),
                           coral_params["w"].astype(jnp.bfloat16).astype(jnp.float32),
                           coral_params["b"], coral_params["raw_thr"], K)
    assert out3.shape == (3, 37, K)
    assert jnp.allclose(out3, ref3, atol=5e-3, rtol=5e-3)
    assert jnp.allclose(jnp.sum(out3, axis=-1), 1.0, atol=1e-5)

    print("KERNEL_OK")
</pallas_src>

<mosaic_0001>
module attributes {stable_mosaic.version = 11 : i64} {
  func.func @_coral_kernel(%arg0: i32, %arg1: memref<128x32xf32, #tpu.memory_space<vmem>>, %arg2: memref<1x32xf32, #tpu.memory_space<vmem>>, %arg3: memref<3x1xf32, #tpu.memory_space<vmem>>, %arg4: memref<4x128xf32, #tpu.memory_space<vmem>>) attributes {dimension_semantics = [#tpu.dimension_semantics<parallel>], iteration_bounds = array<i64: 1>, scalar_prefetch = 0 : i64, scratch_operands = 0 : i64, tpu.core_type = #tpu.core_type<tc>, window_params = [{transform_indices = @transform_0, window_bounds = array<i64: 128, 32>}, {pipeline_mode = #tpu.pipeline_mode<synchronous>, transform_indices = @transform_1, window_bounds = array<i64: 1, 32>}, {pipeline_mode = #tpu.pipeline_mode<synchronous>, transform_indices = @transform_2, window_bounds = array<i64: 3, 1>}, {transform_indices = @transform_3, window_bounds = array<i64: 4, 128>}]} {
    %c0 = arith.constant 0 : index
    %c0_0 = arith.constant 0 : index
    %0 = vector.load %arg1[%c0, %c0_0] : memref<128x32xf32, #tpu.memory_space<vmem>>, vector<128x32xf32>
    %c0_1 = arith.constant 0 : index
    %c0_2 = arith.constant 0 : index
    %1 = vector.load %arg2[%c0_1, %c0_2] : memref<1x32xf32, #tpu.memory_space<vmem>>, vector<1x32xf32>
    %c0_3 = arith.constant 0 : index
    %c0_4 = arith.constant 0 : index
    %2 = vector.load %arg3[%c0_3, %c0_4] : memref<3x1xf32, #tpu.memory_space<vmem>>, vector<3x1xf32>
    %cst = arith.constant dense<0.000000e+00> : vector<1x128xf32>
    %3 = tpu.matmul %1, %0, %cst {dimension_numbers = #tpu.dot_dimension_numbers<[1], [1], [0], [0], [0, 0, 1, 0], [], []>} : vector<1x32xf32>, vector<128x32xf32>, vector<1x128xf32> -> vector<1x128xf32>
    %4 = vector.broadcast %3 : vector<1x128xf32> to vector<3x128xf32>
    %5 = vector.broadcast %2 : vector<3x1xf32> to vector<3x128xf32>
    %6 = arith.subf %4, %5 : vector<3x128xf32>
    %7 = arith.negf %6 : vector<3x128xf32>
    %8 = math.exp %7 : vector<3x128xf32>
    %cst_5 = arith.constant 1.000000e+00 : f32
    %9 = vector.broadcast %cst_5 : f32 to vector<3x128xf32>
    %10 = arith.addf %9, %8 : vector<3x128xf32>
    %11 = arith.divf %9, %10 : vector<3x128xf32>
    %12 = vector.extract_strided_slice %11 {offsets = [0, 0], sizes = [1, 128], strides = [1, 1]} : vector<3x128xf32> to vector<1x128xf32>
    %cst_6 = arith.constant 1.000000e+00 : f32
    %13 = vector.broadcast %cst_6 : f32 to vector<1x128xf32>
    %14 = arith.subf %13, %12 : vector<1x128xf32>
    %15 = vector.extract_strided_slice %11 {offsets = [0, 0], sizes = [2, 128], strides = [1, 1]} : vector<3x128xf32> to vector<2x128xf32>
    %16 = vector.extract_strided_slice %11 {offsets = [1, 0], sizes = [2, 128], strides = [1, 1]} : vector<3x128xf32> to vector<2x128xf32>
    %17 = arith.subf %15, %16 : vector<2x128xf32>
    %18 = vector.extract_strided_slice %11 {offsets = [2, 0], sizes = [1, 128], strides = [1, 1]} : vector<3x128xf32> to vector<1x128xf32>
    %19 = tpu.concatenate %14, %17, %18 in 0 : vector<1x128xf32>, vector<2x128xf32>, vector<1x128xf32> -> vector<4x128xf32>
    %cst_7 = arith.constant 9.99999993E-9 : f32
    %20 = vector.broadcast %cst_7 : f32 to vector<4x128xf32>
    %21 = arith.maximumf %19, %20 : vector<4x128xf32>
    %cst_8 = arith.constant dense<0.000000e+00> : vector<128xf32>
    %22 = vector.multi_reduction <add>, %21, %cst_8 [0] : vector<4x128xf32> to vector<128xf32>
    %23 = vector.shape_cast %22 : vector<128xf32> to vector<1x128xf32>
    %cst_9 = arith.constant 1.000000e+00 : f32
    %24 = vector.broadcast %cst_9 : f32 to vector<1x128xf32>
    %25 = arith.divf %24, %23 : vector<1x128xf32>
    %26 = vector.broadcast %25 : vector<1x128xf32> to vector<4x128xf32>
    %27 = arith.mulf %21, %26 : vector<4x128xf32>
    %c0_10 = arith.constant 0 : index
    %c0_11 = arith.constant 0 : index
    %28 = vector.load %arg4[%c0_10, %c0_11] : memref<4x128xf32, #tpu.memory_space<vmem>>, vector<4x128xf32>
    tpu.vector_store %arg4[%c0_10, %c0_11], %27 {strides = array<i32>} : memref<4x128xf32, #tpu.memory_space<vmem>>, vector<4x128xf32>,
    return
  }
  func.func @transform_0(%arg0: i32) -> (i32, i32) {
    %c0_i32 = arith.constant 0 : i32
    %c0_i32_0 = arith.constant 0 : i32
    return %arg0, %c0_i32 : i32, i32
  }
  func.func @transform_1(%arg0: i32) -> (i32, i32) {
    %c0_i32 = arith.constant 0 : i32
    %c0_i32_0 = arith.constant 0 : i32
    %c0_i32_1 = arith.constant 0 : i32
    return %c0_i32, %c0_i32_0 : i32, i32
  }
  func.func @transform_2(%arg0: i32) -> (i32, i32) {
    %c0_i32 = arith.constant 0 : i32
    %c0_i32_0 = arith.constant 0 : i32
    %c0_i32_1 = arith.constant 0 : i32
    return %c0_i32, %c0_i32_0 : i32, i32
  }
  func.func @transform_3(%arg0: i32) -> (i32, i32) {
    %c0_i32 = arith.constant 0 : i32
    %c0_i32_0 = arith.constant 0 : i32
    return %c0_i32, %arg0 : i32, i32
  }
}

</mosaic_0001>

<bundles_post_ra>
// kernel: tpu_custom_call.1
= control target key start
LH: loop header
LB: loop body
LE: loop exit
PB: predicated region body
PF: predicated region fallthrough
CT: control target
= control target key end

     0   :  { %8 = vsyncpa [#allocation3], 0  ;;  %s473_s0 = inlined_call_operand.hbm [shape: f32[16,32], index: 0, kind: input, shape index: {}]   ;;  %s474_s1 = inlined_call_operand.vmem [shape: f32[1,32], index: 1, kind: input, shape index: {}]   ;;  %s475_s2 = inlined_call_operand.vmem [shape: f32[3,1], index: 2, kind: input, shape index: {}]   ;;  %s476_s3 = inlined_call_operand.hbm [shape: f32[4,16], index: 3, kind: output, shape index: {}]  }
   0x1   :  { %9 = vsyncpa [#allocation4], 0 }
   0x2   :  { %14 = vsyncadd [#allocation3], 1792  ;;  %s392_s12 = smov [#allocation2]   ;;  %s344_s16 = scalar_lea.hbm %s473_s0, 256 }
   0x3   :  { %s15_s13 = sshll.u32 %s392_s12, 4  ;;  %p345_p0 = scmp.ne.s32.totalorder %s473_s0, %s344_s16  ;;  %s16_s13 = int_to_ptr.vmem [resolvable:$true] %s15_s13 }
   0x4   :  { %p348_p1 = scmp.lt.u32.totalorder %s344_s16, %s473_s0 }
   0x6   :  { %p350_p2 = pnand %p348_p1, %p345_p0 }
   0x8   :  { %353 = shalt.err (!%p350_p2)
}
   0x9   :  { %s354_s21 = scalar_lea.vmem %s16_s13, 256  ;;  %s358_s22 = scalar_lea.vmem %s16_s13, 2048 }
   0xa   :  { %p355_p3 = scmp.ne.s32.totalorder %s16_s13, %s354_s21  ;;  %p359_p4 = scmp.lt.s32.totalorder %s16_s13, %s16_s13 }
   0xb   :  { %p360_p5 = scmp.lt.s32.totalorder %s358_s22, %s354_s21 }
   0xd   :  { %p361_p6 = por %p360_p5, %p359_p4 }
   0xf   :  { %p362_p7 = pnand %p361_p6, %p355_p3 }
  0x11   :  { %365 = shalt.err (!%p362_p7)
}
  0x12   :  { %s393_s23 = smov 128   ;;  %s394_s24 = smov 8  }
  0x13   :  { %21 = dma.hbm_to_vmem [thread:$0]  %s473_s0, 256, %s16_s13, [#allocation3], %s393_s23, %s393_s23, %s394_s24  }
  0x14   :  { %388 = dma.done.wait [#allocation3], 2048  }
  0x15   :  { %389 = vsyncadd [#allocation3], 4294965248  ;;  %v395_v0 = vmov 0.0|0.0   ;;  %vm396_vm0 = vmmov 0   ;;  %v397_v1 = vmov 0.0   ;;  %v398_v2 = vmov 0  }
  0x16   :  { %297 = vmatprep.subr.bf16.mxu0 %v395_v0  ;;  %294 = vmatprep.mubr.msk.f32.mxu0 %vm396_vm0, %v397_v1  ;;  %vm47_vm1 = vcmask 261120   ;;  %v29_v3 = vld [vmem:[#allocation2] sm:$0xff]  ;;  %v30_v4 = vld [vmem:[#allocation2 + $0x8] sm:$0xff]  ;;  %v31_v7 = vld [vmem:[#allocation2 + $0x10] sm:$0xff]  ;;  %v169_v30 = vlaneseq  ;;  %vm195_vm3 = vcmask 1040384   ;;  %vm197_vm4 = vcmask 1042432  }
  0x17   :  { %337 = vset.pattern.permute.xlu0 %v398_v2  ;;  %vm434_vm2 = vmpackc.low %vm47_vm1, %vm47_vm1  ;;  %v298_v6 = vpack.c.bf16 %v30_v4, %v29_v3  ;;  %v32_v8 = vld [vmem:[#allocation2 + $0x18] sm:$0xff]  ;;  %v46_v9 = vld [vmem:[%s475_s2] sm:$0x7]  ;;  %vm200_vm5 = vcmask 1043456  }
  0x18   :  { %175 = vperm.xlu0 %337, %v46_v9   ;;  %v302_v10 = vpack.c.bf16 %v32_v8, %v31_v7  ;;  %v33_v11 = vld [vmem:[#allocation2 + $0x20] sm:$0xff]  ;;  %v34_v12 = vld [vmem:[#allocation2 + $0x28] sm:$0xff]  ;;  %v35_v14 = vld [vmem:[#allocation2 + $0x30] sm:$0xff]  ;;  %v170_v31 = vshrl.u32 %v169_v30, 7 }
  0x19   :  { %300 = vmatpush3.bf16.xpose.msk.msra.mxu0 %vm434_vm2, %v298_v6  ;;  %v306_v13 = vpack.c.bf16 %v34_v12, %v33_v11  ;;  %v36_v15 = vld [vmem:[#allocation2 + $0x38] sm:$0xff]  ;;  %v37_v17 = vld [vmem:[#allocation2 + $0x40] sm:$0xff]  ;;  %v38_v18 = vld [vmem:[#allocation2 + $0x48] sm:$0xff] }
  0x1a   :  { %301 = vmatprep.subr.bf16.mxu0 %v395_v0  ;;  %v310_v16 = vpack.c.bf16 %v36_v15, %v35_v14  ;;  %v314_v19 = vpack.c.bf16 %v38_v18, %v37_v17  ;;  %v39_v20 = vld [vmem:[#allocation2 + $0x50] sm:$0xff]  ;;  %v40_v21 = vld [vmem:[#allocation2 + $0x58] sm:$0xff]  ;;  %v41_v23 = vld [vmem:[#allocation2 + $0x60] sm:$0xff]  ;;  %v171_v32 = vsub.s32 0, %v170_v31 }
  0x1b   :  { %v318_v22 = vpack.c.bf16 %v40_v21, %v39_v20  ;;  %v42_v24 = vld [vmem:[#allocation2 + $0x68] sm:$0xff]  ;;  %v43_v26 = vld [vmem:[#allocation2 + $0x70] sm:$0xff]  ;;  %v44_v27 = vld [vmem:[#allocation2 + $0x78] sm:$0xff] }
  0x1c   :  { %v322_v25 = vpack.c.bf16 %v42_v24, %v41_v23  ;;  %v326_v28 = vpack.c.bf16 %v44_v27, %v43_v26  ;;  %v45_v29 = vld [vmem:[%s474_s1] sm:$0x1]  ;;  %s399_s1 = smov [#allocation5]  }
  0x1d   :  { %s218_s29 = sshll.u32 %s399_s1, 4  ;;  %s219_s29 = int_to_ptr.vmem [resolvable:$true] %s218_s29 }
  0x1e   :  { %s366_s30 = scalar_lea.vmem %s219_s29, 64  ;;  %p371_p9 = scmp.lt.s32.totalorder %s219_s29, %s219_s29 }
  0x1f   :  { %p367_p8 = scmp.ne.s32.totalorder %s219_s29, %s366_s30  ;;  %p372_p10 = scmp.lt.s32.totalorder %s366_s30, %s366_s30 }
  0x21   :  { %304 = vmatpush3.bf16.xpose.msk.msra.mxu0 %vm434_vm2, %v302_v10  ;;  %p373_p11 = por %p372_p10, %p371_p9 }
  0x22   :  { %305 = vmatprep.subr.bf16.mxu0 %v395_v0 }
  0x23   :  { %p374_p12 = pnand %p373_p11, %p367_p8 }
  0x29   :  { %308 = vmatpush3.bf16.xpose.msk.msra.mxu0 %vm434_vm2, %v306_v13 }
  0x2a   :  { %309 = vmatprep.subr.bf16.mxu0 %v395_v0 }
  0x31   :  { %312 = vmatpush3.bf16.xpose.msk.msra.mxu0 %vm434_vm2, %v310_v16 }
  0x32   :  { %313 = vmatprep.subr.bf16.mxu0 %v395_v0 }
  0x39   :  { %316 = vmatpush3.bf16.xpose.msk.msra.mxu0 %vm434_vm2, %v314_v19 }
  0x3a   :  { %317 = vmatprep.subr.bf16.mxu0 %v395_v0 }
  0x41   :  { %320 = vmatpush3.bf16.xpose.msk.msra.mxu0 %vm434_vm2, %v318_v22 }
  0x42   :  { %321 = vmatprep.subr.bf16.mxu0 %v395_v0 }
  0x49   :  { %324 = vmatpush3.bf16.xpose.msk.msra.mxu0 %vm434_vm2, %v322_v25 }
  0x4a   :  { %325 = vmatprep.subr.bf16.mxu0 %v395_v0 }
  0x51   :  { %328 = vmatpush3.bf16.xpose.msk.msra.mxu0 %vm434_vm2, %v326_v28 }
  0x58   :  { %295 = vmatmul.mubr.msk.f32.vlgmr.msra.gmra.mrb[0].mxu0 %vm47_vm1, %v45_v29 }
  0x97   :  { %v176_v34 = vpop.permute.xlu0 %175 }
 0x12b   :  { %v165_v33 = vpop.f32.mrb[0].mxu0 }
 0x12c   :  { %v172_v35 = vrot.slane %v165_v33, %v171_v32  ;;  %v296_v36 = vpop.f32.mrb[1].mxu0 }
 0x12e   :  { %v178_v37 = vsub.f32 %v172_v35, %v176_v34 }
 0x130   :  { %v244_v38 = vmul.f32 -1.442695, %v178_v37 }
 0x132   :  { %338 = vpow2.f32 %v244_v38 }
 0x13c   :  { %v339_v39 = vpop.eup %338 }
 0x13d   :  { %v182_v40 = vadd.f32 1.0, %v339_v39 }
 0x13f   :  { %340 = vrcp.f32 %v182_v40 }
 0x149   :  { %v341_v41 = vpop.eup %340 }
 0x14a   :  { %v187_v42 = vrot.slane %v341_v41, 1  ;;  %v185_v44 = vsub.f32 1.0, %v341_v41  ;;  %v193_v46 = vrot.slane %v341_v41, 7 }
 0x14c   :  { %v189_v43 = vsub.f32 %v341_v41, %v187_v42 }
 0x14e   :  { %v191_v45 = vrot.slane %v189_v43, 7 }
 0x150   :  { %v196_v47 = vsel %vm195_vm3, %v185_v44, %v191_v45 }
 0x151   :  { %v198_v48 = vsel %vm197_vm4, %v196_v47, %v193_v46 }
 0x152   :  { %v199_v49 = vmax.f32 %v198_v48, 1e-08 }
 0x154   :  { %v201_v50 = vsel %vm200_vm5, %v199_v49, 0.0 }
 0x155   :  { %v202_v51 = vrot.slane %v201_v50, 4 }
 0x157   :  { %v203_v52 = vadd.f32 %v202_v51, %v201_v50 }
 0x159   :  { %v204_v53 = vrot.slane %v203_v52, 2 }
 0x15b   :  { %v205_v54 = vadd.f32 %v204_v53, %v203_v52 }
 0x15d   :  { %v206_v55 = vrot.slane %v205_v54, 1 }
 0x15f   :  { %v207_v56 = vadd.f32 %v206_v55, %v205_v54 }
 0x161   :  { %342 = vrcp.f32 %v207_v56 }
 0x16b   :  { %v343_v57 = vpop.eup %342 }
 0x16c   :  { %v210_v58 = vmul.f32 %v343_v57, %v199_v49 }
 0x16e   :  { %211 = vst [vmem:[#allocation5] sm:$0xf] %v210_v58 }
 0x16f   :  { %377 = shalt.err (!%p374_p12)
}
 0x170   :  { %s378_s6 = scalar_lea.hbm %s476_s3, 64 }
 0x171   :  { %p379_p13 = scmp.ne.s32.totalorder %s476_s3, %s378_s6  ;;  %p382_p0 = scmp.lt.u32.totalorder %s378_s6, %s476_s3 }
 0x173   :  { %p384_p1 = pnand %p382_p0, %p379_p13 }
 0x175   :  { %387 = shalt.err (!%p384_p1)
}
 0x176   :  { %221 = dma.vmem_to_hbm [thread:$0]  %s219_s29, 64, %s476_s3, [#allocation4]  }
 0x177   :  { %390 = dma.done.wait [#allocation4], 64  }
 0x178   :  { %391 = vsyncadd [#allocation4], 4294967232 }
 0x179   :  { %225 = vsyncpa [#allocation3], 1 }
 0x17a   :  { %226 = vsyncpa [#allocation4], 1 }

</bundles_post_ra>
